<compile_context>
chip_gen: v7x
topology: tpu7x:2x2x1
jax: 0.10.0
libtpu: 0.0.40
codegen_flags: <defaults>
</compile_context>

<pallas_src>
import functools

import jax
import jax.numpy as jnp
from jax.experimental import pallas as pl
from jax.experimental.pallas import tpu as pltpu


# ----------------------------------------------------------------------------
# Pallas kernel: whole-image  relu(conv3x3(x) + bias)  for one batch element,
# plus per-lane-column [sum; sumsq] statistics for the following BatchNorm.
# The 3x3 conv is three row-shifted banded matmuls over a width-and-channel
# flattened layout; width zero-padding lives in zeroed weight taps.
# ----------------------------------------------------------------------------
def conv3x3_relu_kernel(x_ref, w_ref, b_ref, o_ref, st_ref, *, pad_out):
    # x_ref : (H+2, W*Cin)       height-padded, width-flattened rows (one image)
    # w_ref : (3, W*Cin, W*Cout) banded weights (grid-invariant)
    # b_ref : (1 or H, W*Cout)   bias: broadcast row (conv1) / spatial map (conv2)
    # o_ref : (H(+2), W*Cout)    activation (height-padded when pad_out)
    # st_ref: (2, W*Cout)        [sum; sumsq] over the H image rows
    Hpad, _ = x_ref.shape
    KH = w_ref.shape[0]                        # 3, static unroll
    H = Hpad - (KH - 1)
    WC = o_ref.shape[-1]

    # Three M=H, K=W*C, N=W*Cout MXU pushes.
    # TODO(synk): at real UNet sizes, tile H to >=128/256 rows, add a width-tile
    # grid axis (Wt*Cout = 128/256 lanes) and move acc into pltpu.VMEM scratch.
    acc = jnp.zeros((H, WC), jnp.float32)
    for dy in range(KH):
        acc += jnp.dot(x_ref[dy:dy + H, :], w_ref[dy],
                       preferred_element_type=jnp.float32)
    acc += b_ref[...]                          # (1,WC) or (H,WC) broadcast
    a = jnp.maximum(acc, 0.0)                  # fused ReLU

    if pad_out:
        # Emit a height-padded activation so the next conv reads it directly
        # (no jnp.pad HBM round trip between the two convolutions).
        zero_row = jnp.zeros((1, WC), o_ref.dtype)
        o_ref[0:1, :] = zero_row
        o_ref[1:1 + H, :] = a.astype(o_ref.dtype)
        o_ref[1 + H:2 + H, :] = zero_row
    else:
        o_ref[...] = a.astype(o_ref.dtype)     # lane-dense unmasked store

    # Per-lane-column statistics: two direct row stores (no concat relayout).
    st_ref[0:1, :] = jnp.sum(a, axis=0, keepdims=True)
    st_ref[1:2, :] = jnp.sum(a * a, axis=0, keepdims=True)


def conv3x3_relu_rows(x_rows, w_banded, bias_map, *, pad_out):
    """relu(conv3x3 + bias) over height-padded, width-flattened rows.

    x_rows  : (N, H+2, W*Cin)    zero-padded along height only
    w_banded: (3, W*Cin, W*Cout) out-of-range width taps already zeroed
    bias_map: (1 or H, W*Cout)
    returns : activation (N, H(+2), W*Cout), stats (N, 2, W*Cout)
    """
    N, Hpad, K = x_rows.shape
    KH, _, WC = w_banded.shape
    H = Hpad - (KH - 1)
    Hb = bias_map.shape[0]
    H_out = Hpad if pad_out else H

    return pl.pallas_call(
        functools.partial(conv3x3_relu_kernel, pad_out=pad_out),
        out_shape=(jax.ShapeDtypeStruct((N, H_out, WC), jnp.float32),
                   jax.ShapeDtypeStruct((N, 2, WC), jnp.float32)),
        grid=(N,),
        in_specs=[
            # One whole (H+2, W*C) image per step (tiny at these shapes).
            # TODO(synk): at real UNet resolutions, switch to (th+2)-row halo
            # windows so the input block scales with th, not the full image.
            pl.BlockSpec((None, Hpad, K), lambda n: (n, 0, 0)),
            # Grid-invariant weights / bias.
            # TODO(synk): mark these pipeline_mode=pl.Buffered(1) (or preload
            # into a VMEM scratch) once the weight band is big enough for
            # double-buffering to matter under v7x's 64 MiB VMEM.
            pl.BlockSpec((KH, K, WC), lambda n: (0, 0, 0)),
            pl.BlockSpec((Hb, WC), lambda n: (0, 0)),
        ],
        out_specs=(
            pl.BlockSpec((None, H_out, WC), lambda n: (n, 0, 0)),
            pl.BlockSpec((None, 2, WC), lambda n: (n, 0, 0)),
        ),
        compiler_params=pltpu.CompilerParams(
            # Batch axis is parallel (megacore on v7x; plain loop on v5e/v6e).
            # Stats are written once per n (no cross-step accumulation), so
            # "parallel" here is race-free by construction.
            dimension_semantics=("parallel",),
            # Above the v5e 16 MiB scoped default; re-derive per generation
            # (keep under ~48 MiB on v7x) once tiles are sized for real inputs.
            vmem_limit_bytes=32 * 1024 * 1024),
    )(x_rows, w_banded, bias_map)


# ----------------------------------------------------------------------------
# Weight / bias preparation (tiny, runs once per call; no activation traffic)
# ----------------------------------------------------------------------------
def make_banded_weights(w_hwio, W):
    """(KH, KW, Cin, Cout) -> (KH, W*Cin, W*Cout) banded matrices against the
    UNPADDED width layout: the conv along W (pad=1, zeros) becomes one matmul
    per kernel row, with out-of-range width taps zeroed inside the weights, so
    the contraction K is exactly W*Cin (a clean lane tile for conv2)."""
    KH, KW, Cin, Cout = w_hwio.shape
    pad = (KW - 1) // 2
    wi = jnp.arange(W)[:, None]                  # input column
    wo = jnp.arange(W)[None, :]                  # output column
    kx = wi - wo + pad                           # kernel tap index (W, W)
    valid = (kx >= 0) & (kx < KW)
    g = w_hwio[:, jnp.clip(kx, 0, KW - 1)]       # (KH, W_in, W_out, Cin, Cout)
    g = jnp.where(valid[None, :, :, None, None], g, 0.0)
    g = jnp.transpose(g, (0, 1, 3, 2, 4))        # (KH, W_in, Cin, W_out, Cout)
    return g.reshape(KH, W * Cin, W * Cout)


def bias_map_folded(shift_prev, w_hwio, b, H, W):
    """Bias map for a conv whose *previous* BatchNorm has been folded into its
    weights: spatially varying so the zero-padded border is handled exactly."""
    KH, KW, Cin, Cout = w_hwio.shape
    k = jnp.einsum("i,yxio->yxo", shift_prev, w_hwio)          # (KH, KW, Cout)
    hy = jnp.arange(H)[:, None] + jnp.arange(KH)[None, :] - 1  # pad = 1
    wx = jnp.arange(W)[:, None] + jnp.arange(KW)[None, :] - 1
    vy = ((hy >= 0) & (hy < H)).astype(jnp.float32)            # (H, KH)
    vx = ((wx >= 0) & (wx < W)).astype(jnp.float32)            # (W, KW)
    bsp = jnp.einsum("hy,wx,yxo->hwo", vy, vx, k)              # (H, W, Cout)
    return (bsp + b[None, None, :]).reshape(H, W * Cout)


def bn_scale_shift(stats, gamma, beta, H, W, Cout, eps=1e-5):
    """Kernel-emitted per-lane-column [sum; sumsq] (count H each) -> BN
    scale/shift, combined with the Chan/Welford parallel-variance formula to
    avoid the E[x^2] - E[x]^2 cancellation."""
    N = stats.shape[0]
    s = stats.reshape(N, 2, W, Cout)
    sums, sumsqs = s[:, 0], s[:, 1]               # (N, W, Cout), count H each
    count = N * H * W
    mean_col = sums / H
    m2_col = sumsqs - sums * mean_col             # per-column sum of sq. devs
    mean = sums.sum(axis=(0, 1)) / count          # (Cout,)
    m2 = m2_col.sum(axis=(0, 1)) + (H * (mean_col - mean) ** 2).sum(axis=(0, 1))
    var = m2 / count                              # biased variance (PyTorch BN)
    scale = gamma * jax.lax.rsqrt(var + eps)
    shift = beta - mean * scale
    return scale, shift


# ----------------------------------------------------------------------------
# UNetConvBlock forward (NCHW in / NCHW out, like the PyTorch module)
# ----------------------------------------------------------------------------
def unet_conv_block(x_nchw, params, *, eps=1e-5):
    N, Cin, H, W = x_nchw.shape
    Cout = params["w1"].shape[3]

    # NCHW -> NHWC, pad height only (width padding lives in the banded
    # weights), flatten W x C onto the lane axis; fuses with the layout pass.
    x = jnp.transpose(x_nchw, (0, 2, 3, 1))
    xp = jnp.pad(x, ((0, 0), (1, 1), (0, 0), (0, 0))).reshape(N, H + 2, W * Cin)

    # conv1 + ReLU (+ per-column statistics for BN1); its output comes out
    # already height-padded, so conv2 needs no jnp.pad HBM round trip.
    wb1 = make_banded_weights(params["w1"], W)
    bm1 = jnp.tile(params["b1"][None, :], (1, W))              # (1, W*Cout)
    a1p, st1 = conv3x3_relu_rows(xp, wb1, bm1, pad_out=True)

    scale1, shift1 = bn_scale_shift(st1, params["gamma1"], params["beta1"],
                                    H, W, Cout, eps)

    # conv2 with BN1 folded in: scale w2 along its input-channel axis; BN1's
    # shift becomes an exact border-aware spatial bias map.  a1 is consumed
    # raw (zero-padded), so BN1 never touches HBM.
    w2_scaled = params["w2"] * scale1[None, None, :, None]
    wb2 = make_banded_weights(w2_scaled, W)
    bm2 = bias_map_folded(shift1, params["w2"], params["b2"], H, W)
    a2, st2 = conv3x3_relu_rows(a1p, wb2, bm2, pad_out=False)

    # BN2: statistics came out of the kernel; one elementwise apply that XLA
    # fuses with the NHWC -> NCHW transpose below.
    scale2, shift2 = bn_scale_shift(st2, params["gamma2"], params["beta2"],
                                    H, W, Cout, eps)
    y = a2 * jnp.tile(scale2, W)[None, None, :] + jnp.tile(shift2, W)[None, None, :]
    y = y.reshape(N, H, W, Cout)
    return jnp.transpose(y, (0, 3, 1, 2))        # NHWC -> NCHW
    # TODO(synk): PyTorch training-mode BN also updates running_mean/var
    # buffers (a module side effect, not part of the forward output); not modeled.


# ----------------------------------------------------------------------------
# Pure-JAX reference (lax.conv) for validation
# ----------------------------------------------------------------------------
def reference_block(x_nchw, params, eps=1e-5):
    x = jnp.transpose(x_nchw, (0, 2, 3, 1))
    dn = ("NHWC", "HWIO", "NHWC")

    def conv_relu(x, w, b):
        y = jax.lax.conv_general_dilated(x, w, (1, 1), "SAME",
                                         dimension_numbers=dn)
        return jnp.maximum(y + b[None, None, None, :], 0.0)

    def bn(x, g, b):
        mean = jnp.mean(x, axis=(0, 1, 2), keepdims=True)
        var = jnp.mean((x - mean) ** 2, axis=(0, 1, 2), keepdims=True)
        return (x - mean) * jax.lax.rsqrt(var + eps) * g + b

    x = bn(conv_relu(x, params["w1"], params["b1"]),
           params["gamma1"], params["beta1"])
    x = bn(conv_relu(x, params["w2"], params["b2"]),
           params["gamma2"], params["beta2"])
    return jnp.transpose(x, (0, 3, 1, 2))


def init_params(key, in_size, out_size):
    ks = jax.random.split(key, 8)
    s1 = 1.0 / jnp.sqrt(in_size * 9.0)
    s2 = 1.0 / jnp.sqrt(out_size * 9.0)
    return {
        "w1": jax.random.uniform(ks[0], (3, 3, in_size, out_size),
                                 jnp.float32, -s1, s1),
        "b1": jax.random.uniform(ks[1], (out_size,), jnp.float32, -s1, s1),
        "w2": jax.random.uniform(ks[2], (3, 3, out_size, out_size),
                                 jnp.float32, -s2, s2),
        "b2": jax.random.uniform(ks[3], (out_size,), jnp.float32, -s2, s2),
        # Non-trivial affine params so the BN fold is actually exercised.
        "gamma1": 1.0 + 0.2 * jax.random.normal(ks[4], (out_size,), jnp.float32),
        "beta1": 0.1 * jax.random.normal(ks[5], (out_size,), jnp.float32),
        "gamma2": 1.0 + 0.2 * jax.random.normal(ks[6], (out_size,), jnp.float32),
        "beta2": 0.1 * jax.random.normal(ks[7], (out_size,), jnp.float32),
    }


if __name__ == "__main__":
    key = jax.random.PRNGKey(0)
    kx, kp = jax.random.split(key)

    N, Cin, H, W = 2, 4, 16, 16
    Cout = 8                      # W * Cout = 128 -> lane-dense 128-wide tiles

    x = jax.random.normal(kx, (N, Cin, H, W), jnp.float32)
    params = init_params(kp, Cin, Cout)

    fwd = jax.jit(unet_conv_block)
    out = fwd(x, params)
    jax.block_until_ready(out)

    ref = reference_block(x, params)
    assert out.shape == (N, Cout, H, W), out.shape
    err = float(jnp.max(jnp.abs(out - ref)))
    assert err < 2e-4, err

    print("KERNEL_OK")
</pallas_src>

<mosaic_0001>
module attributes {stable_mosaic.version = 11 : i64} {
  func.func @conv3x3_relu_kernel(%arg0: i32, %arg1: memref<1x18x64xf32, #tpu.memory_space<vmem>>, %arg2: memref<3x64x128xf32, #tpu.memory_space<vmem>>, %arg3: memref<1x128xf32, #tpu.memory_space<vmem>>, %arg4: memref<1x18x128xf32, #tpu.memory_space<vmem>>, %arg5: memref<1x2x128xf32, #tpu.memory_space<vmem>>) attributes {dimension_semantics = [#tpu.dimension_semantics<parallel>], iteration_bounds = array<i64: 2>, scalar_prefetch = 0 : i64, scratch_operands = 0 : i64, tpu.core_type = #tpu.core_type<tc>, window_params = [{transform_indices = @transform_0, window_bounds = array<i64: 1, 18, 64>}, {pipeline_mode = #tpu.pipeline_mode<synchronous>, transform_indices = @transform_1, window_bounds = array<i64: 3, 64, 128>}, {pipeline_mode = #tpu.pipeline_mode<synchronous>, transform_indices = @transform_2, window_bounds = array<i64: 1, 128>}, {transform_indices = @transform_3, window_bounds = array<i64: 1, 18, 128>}, {transform_indices = @transform_4, window_bounds = array<i64: 1, 2, 128>}]} {
    %cst = arith.constant 0.000000e+00 : f32
    %0 = vector.broadcast %cst : f32 to vector<16x128xf32>
    %c0 = arith.constant 0 : index
    %c0_0 = arith.constant 0 : index
    %c0_1 = arith.constant 0 : index
    %1 = vector.load %arg1[%c0, %c0_0, %c0_1] : memref<1x18x64xf32, #tpu.memory_space<vmem>>, vector<1x16x64xf32>
    %2 = vector.shape_cast %1 : vector<1x16x64xf32> to vector<16x64xf32>
    %c0_2 = arith.constant 0 : index
    %c0_3 = arith.constant 0 : index
    %c0_4 = arith.constant 0 : index
    %3 = vector.load %arg2[%c0_2, %c0_3, %c0_4] : memref<3x64x128xf32, #tpu.memory_space<vmem>>, vector<1x64x128xf32>
    %4 = vector.shape_cast %3 : vector<1x64x128xf32> to vector<64x128xf32>
    %cst_5 = arith.constant dense<0.000000e+00> : vector<16x128xf32>
    %5 = tpu.matmul %2, %4, %cst_5 {dimension_numbers = #tpu.dot_dimension_numbers<[1], [0], [0], [1], [0, 0, 1, 1], [], []>} : vector<16x64xf32>, vector<64x128xf32>, vector<16x128xf32> -> vector<16x128xf32>
    %6 = arith.addf %0, %5 : vector<16x128xf32>
    %c0_6 = arith.constant 0 : index
    %c1 = arith.constant 1 : index
    %c0_7 = arith.constant 0 : index
    %7 = vector.load %arg1[%c0_6, %c1, %c0_7] : memref<1x18x64xf32, #tpu.memory_space<vmem>>, vector<1x16x64xf32>
    %8 = vector.shape_cast %7 : vector<1x16x64xf32> to vector<16x64xf32>
    %c1_8 = arith.constant 1 : index
    %c0_9 = arith.constant 0 : index
    %c0_10 = arith.constant 0 : index
    %9 = vector.load %arg2[%c1_8, %c0_9, %c0_10] : memref<3x64x128xf32, #tpu.memory_space<vmem>>, vector<1x64x128xf32>
    %10 = vector.shape_cast %9 : vector<1x64x128xf32> to vector<64x128xf32>
    %cst_11 = arith.constant dense<0.000000e+00> : vector<16x128xf32>
    %11 = tpu.matmul %8, %10, %cst_11 {dimension_numbers = #tpu.dot_dimension_numbers<[1], [0], [0], [1], [0, 0, 1, 1], [], []>} : vector<16x64xf32>, vector<64x128xf32>, vector<16x128xf32> -> vector<16x128xf32>
    %12 = arith.addf %6, %11 : vector<16x128xf32>
    %c0_12 = arith.constant 0 : index
    %c2 = arith.constant 2 : index
    %c0_13 = arith.constant 0 : index
    %13 = vector.load %arg1[%c0_12, %c2, %c0_13] : memref<1x18x64xf32, #tpu.memory_space<vmem>>, vector<1x16x64xf32>
    %14 = vector.shape_cast %13 : vector<1x16x64xf32> to vector<16x64xf32>
    %c2_14 = arith.constant 2 : index
    %c0_15 = arith.constant 0 : index
    %c0_16 = arith.constant 0 : index
    %15 = vector.load %arg2[%c2_14, %c0_15, %c0_16] : memref<3x64x128xf32, #tpu.memory_space<vmem>>, vector<1x64x128xf32>
    %16 = vector.shape_cast %15 : vector<1x64x128xf32> to vector<64x128xf32>
    %cst_17 = arith.constant dense<0.000000e+00> : vector<16x128xf32>
    %17 = tpu.matmul %14, %16, %cst_17 {dimension_numbers = #tpu.dot_dimension_numbers<[1], [0], [0], [1], [0, 0, 1, 1], [], []>} : vector<16x64xf32>, vector<64x128xf32>, vector<16x128xf32> -> vector<16x128xf32>
    %18 = arith.addf %12, %17 : vector<16x128xf32>
    %c0_18 = arith.constant 0 : index
    %c0_19 = arith.constant 0 : index
    %19 = vector.load %arg3[%c0_18, %c0_19] : memref<1x128xf32, #tpu.memory_space<vmem>>, vector<1x128xf32>
    %20 = vector.broadcast %19 : vector<1x128xf32> to vector<16x128xf32>
    %21 = arith.addf %18, %20 : vector<16x128xf32>
    %cst_20 = arith.constant 0.000000e+00 : f32
    %22 = vector.broadcast %cst_20 : f32 to vector<16x128xf32>
    %23 = arith.maximumf %21, %22 : vector<16x128xf32>
    %cst_21 = arith.constant 0.000000e+00 : f32
    %24 = vector.broadcast %cst_21 : f32 to vector<1x128xf32>
    %c0_22 = arith.constant 0 : index
    %c0_23 = arith.constant 0 : index
    %c0_24 = arith.constant 0 : index
    %25 = vector.load %arg4[%c0_22, %c0_23, %c0_24] : memref<1x18x128xf32, #tpu.memory_space<vmem>>, vector<1x1x128xf32>
    %26 = vector.shape_cast %25 : vector<1x1x128xf32> to vector<1x128xf32>
    %27 = vector.shape_cast %24 : vector<1x128xf32> to vector<1x1x128xf32>
    tpu.vector_store %arg4[%c0_22, %c0_23, %c0_24], %27 {strides = array<i32>} : memref<1x18x128xf32, #tpu.memory_space<vmem>>, vector<1x1x128xf32>,
    %c0_25 = arith.constant 0 : index
    %c1_26 = arith.constant 1 : index
    %c0_27 = arith.constant 0 : index
    %28 = vector.load %arg4[%c0_25, %c1_26, %c0_27] : memref<1x18x128xf32, #tpu.memory_space<vmem>>, vector<1x16x128xf32>
    %29 = vector.shape_cast %28 : vector<1x16x128xf32> to vector<16x128xf32>
    %30 = vector.shape_cast %23 : vector<16x128xf32> to vector<1x16x128xf32>
    tpu.vector_store %arg4[%c0_25, %c1_26, %c0_27], %30 {strides = array<i32>} : memref<1x18x128xf32, #tpu.memory_space<vmem>>, vector<1x16x128xf32>,
    %c0_28 = arith.constant 0 : index
    %c17 = arith.constant 17 : index
    %c0_29 = arith.constant 0 : index
    %31 = vector.load %arg4[%c0_28, %c17, %c0_29] : memref<1x18x128xf32, #tpu.memory_space<vmem>>, vector<1x1x128xf32>
    %32 = vector.shape_cast %31 : vector<1x1x128xf32> to vector<1x128xf32>
    %33 = vector.shape_cast %24 : vector<1x128xf32> to vector<1x1x128xf32>
    tpu.vector_store %arg4[%c0_28, %c17, %c0_29], %33 {strides = array<i32>} : memref<1x18x128xf32, #tpu.memory_space<vmem>>, vector<1x1x128xf32>,
    %cst_30 = arith.constant dense<0.000000e+00> : vector<128xf32>
    %34 = vector.multi_reduction <add>, %23, %cst_30 [0] : vector<16x128xf32> to vector<128xf32>
    %35 = vector.shape_cast %34 : vector<128xf32> to vector<1x128xf32>
    %c0_31 = arith.constant 0 : index
    %c0_32 = arith.constant 0 : index
    %c0_33 = arith.constant 0 : index
    %36 = vector.load %arg5[%c0_31, %c0_32, %c0_33] : memref<1x2x128xf32, #tpu.memory_space<vmem>>, vector<1x1x128xf32>
    %37 = vector.shape_cast %36 : vector<1x1x128xf32> to vector<1x128xf32>
    %38 = vector.shape_cast %35 : vector<1x128xf32> to vector<1x1x128xf32>
    tpu.vector_store %arg5[%c0_31, %c0_32, %c0_33], %38 {strides = array<i32>} : memref<1x2x128xf32, #tpu.memory_space<vmem>>, vector<1x1x128xf32>,
    %39 = arith.mulf %23, %23 : vector<16x128xf32>
    %cst_34 = arith.constant dense<0.000000e+00> : vector<128xf32>
    %40 = vector.multi_reduction <add>, %39, %cst_34 [0] : vector<16x128xf32> to vector<128xf32>
    %41 = vector.shape_cast %40 : vector<128xf32> to vector<1x128xf32>
    %c0_35 = arith.constant 0 : index
    %c1_36 = arith.constant 1 : index
    %c0_37 = arith.constant 0 : index
    %42 = vector.load %arg5[%c0_35, %c1_36, %c0_37] : memref<1x2x128xf32, #tpu.memory_space<vmem>>, vector<1x1x128xf32>
    %43 = vector.shape_cast %42 : vector<1x1x128xf32> to vector<1x128xf32>
    %44 = vector.shape_cast %41 : vector<1x128xf32> to vector<1x1x128xf32>
    tpu.vector_store %arg5[%c0_35, %c1_36, %c0_37], %44 {strides = array<i32>} : memref<1x2x128xf32, #tpu.memory_space<vmem>>, vector<1x1x128xf32>,
    return
  }
  func.func @transform_0(%arg0: i32) -> (i32, i32, i32) {
    %c0_i32 = arith.constant 0 : i32
    %c0_i32_0 = arith.constant 0 : i32
    %c0_i32_1 = arith.constant 0 : i32
    return %arg0, %c0_i32, %c0_i32_0 : i32, i32, i32
  }
  func.func @transform_1(%arg0: i32) -> (i32, i32, i32) {
    %c0_i32 = arith.constant 0 : i32
    %c0_i32_0 = arith.constant 0 : i32
    %c0_i32_1 = arith.constant 0 : i32
    %c0_i32_2 = arith.constant 0 : i32
    return %c0_i32, %c0_i32_0, %c0_i32_1 : i32, i32, i32
  }
  func.func @transform_2(%arg0: i32) -> (i32, i32) {
    %c0_i32 = arith.constant 0 : i32
    %c0_i32_0 = arith.constant 0 : i32
    %c0_i32_1 = arith.constant 0 : i32
    return %c0_i32, %c0_i32_0 : i32, i32
  }
  func.func @transform_3(%arg0: i32) -> (i32, i32, i32) {
    %c0_i32 = arith.constant 0 : i32
    %c0_i32_0 = arith.constant 0 : i32
    %c0_i32_1 = arith.constant 0 : i32
    return %arg0, %c0_i32, %c0_i32_0 : i32, i32, i32
  }
  func.func @transform_4(%arg0: i32) -> (i32, i32, i32) {
    %c0_i32 = arith.constant 0 : i32
    %c0_i32_0 = arith.constant 0 : i32
    %c0_i32_1 = arith.constant 0 : i32
    return %arg0, %c0_i32, %c0_i32_0 : i32, i32, i32
  }
}

module attributes {stable_mosaic.version = 11 : i64} {
  func.func @conv3x3_relu_kernel(%arg0: i32, %arg1: memref<1x18x128xf32, #tpu.memory_space<vmem>>, %arg2: memref<3x128x128xf32, #tpu.memory_space<vmem>>, %arg3: memref<16x128xf32, #tpu.memory_space<vmem>>, %arg4: memref<1x16x128xf32, #tpu.memory_space<vmem>>, %arg5: memref<1x2x128xf32, #tpu.memory_space<vmem>>) attributes {dimension_semantics = [#tpu.dimension_semantics<parallel>], iteration_bounds = array<i64: 2>, scalar_prefetch = 0 : i64, scratch_operands = 0 : i64, tpu.core_type = #tpu.core_type<tc>, window_params = [{transform_indices = @transform_0, window_bounds = array<i64: 1, 18, 128>}, {pipeline_mode = #tpu.pipeline_mode<synchronous>, transform_indices = @transform_1, window_bounds = array<i64: 3, 128, 128>}, {pipeline_mode = #tpu.pipeline_mode<synchronous>, transform_indices = @transform_2, window_bounds = array<i64: 16, 128>}, {transform_indices = @transform_3, window_bounds = array<i64: 1, 16, 128>}, {transform_indices = @transform_4, window_bounds = array<i64: 1, 2, 128>}]} {
    %cst = arith.constant 0.000000e+00 : f32
    %0 = vector.broadcast %cst : f32 to vector<16x128xf32>
    %c0 = arith.constant 0 : index
    %c0_0 = arith.constant 0 : index
    %c0_1 = arith.constant 0 : index
    %1 = vector.load %arg1[%c0, %c0_0, %c0_1] : memref<1x18x128xf32, #tpu.memory_space<vmem>>, vector<1x16x128xf32>
    %2 = vector.shape_cast %1 : vector<1x16x128xf32> to vector<16x128xf32>
    %c0_2 = arith.constant 0 : index
    %c0_3 = arith.constant 0 : index
    %c0_4 = arith.constant 0 : index
    %3 = vector.load %arg2[%c0_2, %c0_3, %c0_4] : memref<3x128x128xf32, #tpu.memory_space<vmem>>, vector<1x128x128xf32>
    %4 = vector.shape_cast %3 : vector<1x128x128xf32> to vector<128x128xf32>
    %cst_5 = arith.constant dense<0.000000e+00> : vector<16x128xf32>
    %5 = tpu.matmul %2, %4, %cst_5 {dimension_numbers = #tpu.dot_dimension_numbers<[1], [0], [0], [1], [0, 0, 1, 1], [], []>} : vector<16x128xf32>, vector<128x128xf32>, vector<16x128xf32> -> vector<16x128xf32>
    %6 = arith.addf %0, %5 : vector<16x128xf32>
    %c0_6 = arith.constant 0 : index
    %c1 = arith.constant 1 : index
    %c0_7 = arith.constant 0 : index
    %7 = vector.load %arg1[%c0_6, %c1, %c0_7] : memref<1x18x128xf32, #tpu.memory_space<vmem>>, vector<1x16x128xf32>
    %8 = vector.shape_cast %7 : vector<1x16x128xf32> to vector<16x128xf32>
    %c1_8 = arith.constant 1 : index
    %c0_9 = arith.constant 0 : index
    %c0_10 = arith.constant 0 : index
    %9 = vector.load %arg2[%c1_8, %c0_9, %c0_10] : memref<3x128x128xf32, #tpu.memory_space<vmem>>, vector<1x128x128xf32>
    %10 = vector.shape_cast %9 : vector<1x128x128xf32> to vector<128x128xf32>
    %cst_11 = arith.constant dense<0.000000e+00> : vector<16x128xf32>
    %11 = tpu.matmul %8, %10, %cst_11 {dimension_numbers = #tpu.dot_dimension_numbers<[1], [0], [0], [1], [0, 0, 1, 1], [], []>} : vector<16x128xf32>, vector<128x128xf32>, vector<16x128xf32> -> vector<16x128xf32>
    %12 = arith.addf %6, %11 : vector<16x128xf32>
    %c0_12 = arith.constant 0 : index
    %c2 = arith.constant 2 : index
    %c0_13 = arith.constant 0 : index
    %13 = vector.load %arg1[%c0_12, %c2, %c0_13] : memref<1x18x128xf32, #tpu.memory_space<vmem>>, vector<1x16x128xf32>
    %14 = vector.shape_cast %13 : vector<1x16x128xf32> to vector<16x128xf32>
    %c2_14 = arith.constant 2 : index
    %c0_15 = arith.constant 0 : index
    %c0_16 = arith.constant 0 : index
    %15 = vector.load %arg2[%c2_14, %c0_15, %c0_16] : memref<3x128x128xf32, #tpu.memory_space<vmem>>, vector<1x128x128xf32>
    %16 = vector.shape_cast %15 : vector<1x128x128xf32> to vector<128x128xf32>
    %cst_17 = arith.constant dense<0.000000e+00> : vector<16x128xf32>
    %17 = tpu.matmul %14, %16, %cst_17 {dimension_numbers = #tpu.dot_dimension_numbers<[1], [0], [0], [1], [0, 0, 1, 1], [], []>} : vector<16x128xf32>, vector<128x128xf32>, vector<16x128xf32> -> vector<16x128xf32>
    %18 = arith.addf %12, %17 : vector<16x128xf32>
    %c0_18 = arith.constant 0 : index
    %c0_19 = arith.constant 0 : index
    %19 = vector.load %arg3[%c0_18, %c0_19] : memref<16x128xf32, #tpu.memory_space<vmem>>, vector<16x128xf32>
    %20 = arith.addf %18, %19 : vector<16x128xf32>
    %cst_20 = arith.constant 0.000000e+00 : f32
    %21 = vector.broadcast %cst_20 : f32 to vector<16x128xf32>
    %22 = arith.maximumf %20, %21 : vector<16x128xf32>
    %c0_21 = arith.constant 0 : index
    %c0_22 = arith.constant 0 : index
    %c0_23 = arith.constant 0 : index
    %23 = vector.load %arg4[%c0_21, %c0_22, %c0_23] : memref<1x16x128xf32, #tpu.memory_space<vmem>>, vector<1x16x128xf32>
    %24 = vector.shape_cast %23 : vector<1x16x128xf32> to vector<16x128xf32>
    %25 = vector.shape_cast %22 : vector<16x128xf32> to vector<1x16x128xf32>
    tpu.vector_store %arg4[%c0_21, %c0_22, %c0_23], %25 {strides = array<i32>} : memref<1x16x128xf32, #tpu.memory_space<vmem>>, vector<1x16x128xf32>,
    %cst_24 = arith.constant dense<0.000000e+00> : vector<128xf32>
    %26 = vector.multi_reduction <add>, %22, %cst_24 [0] : vector<16x128xf32> to vector<128xf32>
    %27 = vector.shape_cast %26 : vector<128xf32> to vector<1x128xf32>
    %c0_25 = arith.constant 0 : index
    %c0_26 = arith.constant 0 : index
    %c0_27 = arith.constant 0 : index
    %28 = vector.load %arg5[%c0_25, %c0_26, %c0_27] : memref<1x2x128xf32, #tpu.memory_space<vmem>>, vector<1x1x128xf32>
    %29 = vector.shape_cast %28 : vector<1x1x128xf32> to vector<1x128xf32>
    %30 = vector.shape_cast %27 : vector<1x128xf32> to vector<1x1x128xf32>
    tpu.vector_store %arg5[%c0_25, %c0_26, %c0_27], %30 {strides = array<i32>} : memref<1x2x128xf32, #tpu.memory_space<vmem>>, vector<1x1x128xf32>,
    %31 = arith.mulf %22, %22 : vector<16x128xf32>
    %cst_28 = arith.constant dense<0.000000e+00> : vector<128xf32>
    %32 = vector.multi_reduction <add>, %31, %cst_28 [0] : vector<16x128xf32> to vector<128xf32>
    %33 = vector.shape_cast %32 : vector<128xf32> to vector<1x128xf32>
    %c0_29 = arith.constant 0 : index
    %c1_30 = arith.constant 1 : index
    %c0_31 = arith.constant 0 : index
    %34 = vector.load %arg5[%c0_29, %c1_30, %c0_31] : memref<1x2x128xf32, #tpu.memory_space<vmem>>, vector<1x1x128xf32>
    %35 = vector.shape_cast %34 : vector<1x1x128xf32> to vector<1x128xf32>
    %36 = vector.shape_cast %33 : vector<1x128xf32> to vector<1x1x128xf32>
    tpu.vector_store %arg5[%c0_29, %c1_30, %c0_31], %36 {strides = array<i32>} : memref<1x2x128xf32, #tpu.memory_space<vmem>>, vector<1x1x128xf32>,
    return
  }
  func.func @transform_0(%arg0: i32) -> (i32, i32, i32) {
    %c0_i32 = arith.constant 0 : i32
    %c0_i32_0 = arith.constant 0 : i32
    %c0_i32_1 = arith.constant 0 : i32
    return %arg0, %c0_i32, %c0_i32_0 : i32, i32, i32
  }
  func.func @transform_1(%arg0: i32) -> (i32, i32, i32) {
    %c0_i32 = arith.constant 0 : i32
    %c0_i32_0 = arith.constant 0 : i32
    %c0_i32_1 = arith.constant 0 : i32
    %c0_i32_2 = arith.constant 0 : i32
    return %c0_i32, %c0_i32_0, %c0_i32_1 : i32, i32, i32
  }
  func.func @transform_2(%arg0: i32) -> (i32, i32) {
    %c0_i32 = arith.constant 0 : i32
    %c0_i32_0 = arith.constant 0 : i32
    %c0_i32_1 = arith.constant 0 : i32
    return %c0_i32, %c0_i32_0 : i32, i32
  }
  func.func @transform_3(%arg0: i32) -> (i32, i32, i32) {
    %c0_i32 = arith.constant 0 : i32
    %c0_i32_0 = arith.constant 0 : i32
    %c0_i32_1 = arith.constant 0 : i32
    return %arg0, %c0_i32, %c0_i32_0 : i32, i32, i32
  }
  func.func @transform_4(%arg0: i32) -> (i32, i32, i32) {
    %c0_i32 = arith.constant 0 : i32
    %c0_i32_0 = arith.constant 0 : i32
    %c0_i32_1 = arith.constant 0 : i32
    return %arg0, %c0_i32, %c0_i32_0 : i32, i32, i32
  }
}

</mosaic_0001>

<bundles_post_ra>
// kernel: unet_conv_block.2
= control target key start
LH: loop header
LB: loop body
LE: loop exit
PB: predicated region body
PF: predicated region fallthrough
CT: control target
= control target key end

     0   :  { %s822_s15 = smov 0   ;;  %s939_s0 = inlined_call_operand.vmem [shape: f32[2,18,64], index: 0, kind: input, shape index: {}]   ;;  %s940_s1 = inlined_call_operand.vmem [shape: f32[3,64,128], index: 1, kind: input, shape index: {}]   ;;  %s941_s2 = inlined_call_operand.vmem [shape: f32[1,128], index: 2, kind: input, shape index: {}]   ;;  %s942_s3 = inlined_call_operand.vmem [shape: f32[2,18,128], index: 3, kind: output, shape index: {0}]   ;;  %s943_s4 = inlined_call_operand.vmem [shape: f32[2,2,128], index: 4, kind: output, shape index: {1}]  }
   0x1 LB: > { %s606_s16 = sadd.s32 4294967295, %s794_s15   ;;  %p610_p0 = scmp.ge.s32.totalorder %s794_s15, 1  ;;  %s794_s15 = sphi %s822_s15, %s15_s15  }
   0x2   : > { %p165_p1 = scmp.lt.s32.totalorder %s794_s15, 3 }
   0x4   : > { %p166_p2 = pnand %p610_p0, %p165_p1 }
   0x5   : > { %v211_v0 = vld [vmem:[%s940_s1] sm:$0xff] (!%p166_p2)  ;;  %v212_v1 = vld [vmem:[%s940_s1 + $0x8] sm:$0xff] (!%p166_p2)  ;;  %v213_v2 = vld [vmem:[%s940_s1 + $0x10] sm:$0xff] (!%p166_p2)  ;;  %p195_p3 = scmp.lt.s32.totalorder (!%p166_p2), %s606_s16, 1  ;;  %vm230_vm0 = vcmask (!%p166_p2), 523264   ;;  %v796_v42 = vmov (!%p166_p2), 0.0  }
   0x6   : > { %169 = sbr.rel (%p166_p2) target bundleno = 276 (0x114), region = 32  ;;  %v742_v3 = vpack.c.bf16 (!%p166_p2), %v212_v1, %v211_v0  ;;  %v214_v4 = vld [vmem:[%s940_s1 + $0x18] sm:$0xff] (!%p166_p2)  ;;  %v215_v6 = vld [vmem:[%s940_s1 + $0x20] sm:$0xff] (!%p166_p2)  ;;  %v216_v7 = vld [vmem:[%s940_s1 + $0x28] sm:$0xff] (!%p166_p2) }
   0x7   : > { %v746_v5 = vpack.c.bf16 (!%p166_p2), %v214_v4, %v213_v2  ;;  %v614_v8 = vld [vmem:[%s940_s1 + $0x40] sm:$0xff] (!%p166_p2)  ;;  %v615_v9 = vld [vmem:[%s940_s1 + $0x48] sm:$0xff] (!%p166_p2)  ;;  %v616_v11 = vld [vmem:[%s940_s1 + $0x50] sm:$0xff] (!%p166_p2)  ;;  %v750_v13 = vpack.c.bf16 (!%p166_p2), %v216_v7, %v215_v6 }
   0x8   : > { %743 = vmatprep.subr.bf16.mxu0 (!%p166_p2), %v742_v3  ;;  %v726_v10 = vpack.c.bf16 (!%p166_p2), %v615_v9, %v614_v8  ;;  %v617_v12 = vld [vmem:[%s940_s1 + $0x58] sm:$0xff] (!%p166_p2)  ;;  %v618_v15 = vld [vmem:[%s940_s1 + $0x60] sm:$0xff] (!%p166_p2)  ;;  %v619_v16 = vld [vmem:[%s940_s1 + $0x68] sm:$0xff] (!%p166_p2) }
   0x9   : > { %745 = vmatpush3.bf16.msra.mxu0 (!%p166_p2), %v742_v3  ;;  %v730_v14 = vpack.c.bf16 (!%p166_p2), %v617_v12, %v616_v11  ;;  %v217_v17 = vld [vmem:[%s940_s1 + $0x30] sm:$0xff] (!%p166_p2)  ;;  %v218_v18 = vld [vmem:[%s940_s1 + $0x38] sm:$0xff] (!%p166_p2)  ;;  %v734_v20 = vpack.c.bf16 (!%p166_p2), %v619_v16, %v618_v15  ;;  %v626_v25 = vld [vmem:[%s940_s1 + $0x80] sm:$0xff] (!%p166_p2) }
   0xa   : > { %747 = vmatprep.subr.bf16.mxu0 (!%p166_p2), %v746_v5  ;;  %727 = vmatprep.subr.bf16.mxu1 (!%p166_p2), %v726_v10  ;;  %v754_v22 = vpack.c.bf16 (!%p166_p2), %v218_v18, %v217_v17  ;;  %v620_v23 = vld [vmem:[%s940_s1 + $0x70] sm:$0xff] (!%p166_p2)  ;;  %v621_v24 = vld [vmem:[%s940_s1 + $0x78] sm:$0xff] (!%p166_p2)  ;;  %v627_v26 = vld [vmem:[%s940_s1 + $0x88] sm:$0xff] (!%p166_p2) }
   0xb   : > { %729 = vmatpush3.bf16.msra.mxu1 (!%p166_p2), %v726_v10  ;;  %v738_v27 = vpack.c.bf16 (!%p166_p2), %v621_v24, %v620_v23  ;;  %v758_v28 = vpack.c.bf16 (!%p166_p2), %v627_v26, %v626_v25  ;;  %v628_v29 = vld [vmem:[%s940_s1 + $0x90] sm:$0xff] (!%p166_p2)  ;;  %v629_v30 = vld [vmem:[%s940_s1 + $0x98] sm:$0xff] (!%p166_p2)  ;;  %v630_v34 = vld [vmem:[%s940_s1 + $0xa0] sm:$0xff] (!%p166_p2) }
   0xc   : > { %731 = vmatprep.subr.bf16.mxu1 (!%p166_p2), %v730_v14  ;;  %v762_v32 = vpack.c.bf16 (!%p166_p2), %v629_v30, %v628_v29  ;;  %v631_v35 = vld [vmem:[%s940_s1 + $0xa8] sm:$0xff] (!%p166_p2)  ;;  %v632_v38 = vld [vmem:[%s940_s1 + $0xb0] sm:$0xff] (!%p166_p2)  ;;  %v633_v39 = vld [vmem:[%s940_s1 + $0xb8] sm:$0xff] (!%p166_p2) }
   0xd   : > { %s945_s16 = smov (!%p195_p3, %s606_s16), 1  ;;  %749 = vmatpush3.bf16.msra.mxu0 %v746_v5  ;;  %v766_v37 = vpack.c.bf16 %v631_v35, %v630_v34  ;;  %v770_v40 = vpack.c.bf16 %v633_v39, %v632_v38  ;;  %v636_v46 = vld [vmem:[%s941_s2] ss:$0 sm:$0xff] }
   0xe   : > { %s778_s7 = smul.u32 24, %s945_s16  ;;  %751 = vmatprep.subr.bf16.mxu0 %v750_v13 }
   0xf   : > { %733 = vmatpush3.bf16.msra.mxu1 %v730_v14 }
  0x10   : > { %s880_s24 = scalar_lea.vmem %s939_s0, %s778_s7  ;;  %735 = vmatprep.subr.bf16.mxu1 %v734_v20  ;;  %s204_s25 = scalar_lea.vmem %s942_s3, %s778_s7 }
  0x11   : > { %v209_v19 = vld [vmem:[%s880_s24] sm:$0xff]  ;;  %753 = vmatpush3.bf16.msra.mxu0 %v750_v13  ;;  %v210_v31 = vld [vmem:[%s880_s24 + $0x8] sm:$0xff]  ;;  %498 = vst [vmem:[%s204_s25] sm:$0x1] %v796_v42  ;;  %501 = vst [vmem:[%s204_s25 + $0x11] sm:$0x1] %v796_v42  ;;  %s613_s7 = sshll.u32 %s945_s16, 1 }
  0x12   : > { %704 = vmatprep.mubr.msk.f32.mxu0 %vm230_vm0, %v209_v19  ;;  %v219_v21 = vld [vmem:[%s880_s24 + $0x1] sm:$0xff]  ;;  %755 = vmatprep.subr.bf16.mxu0 %v754_v22  ;;  %v220_v36 = vld [vmem:[%s880_s24 + $0x9] sm:$0xff]  ;;  %s208_s29 = scalar_lea.vmem %s943_s4, %s613_s7 }
  0x13   : > { %685 = vmatprep.mubr.msk.f32.mxu1 %vm230_vm0, %v219_v21  ;;  %737 = vmatpush3.bf16.msra.mxu1 %v734_v20  ;;  %v393_v33 = vld [vmem:[%s880_s24 + $0x2] sm:$0xff]  ;;  %v394_v41 = vld [vmem:[%s880_s24 + $0xa] sm:$0xff] }
  0x14   : > { %739 = vmatprep.subr.bf16.mxu1 %v738_v27 }
  0x15   : > { %757 = vmatpush3.bf16.msra.mxu0 %v754_v22 }
  0x16   : > { %759 = vmatprep.subr.bf16.mxu0 %v758_v28 }
  0x17   : > { %741 = vmatpush3.bf16.msra.mxu1 %v738_v27 }
  0x18   : > { %705 = vmatmul.mubr.msk.f32.vlgmr.msra.gmra.mrb[0].mxu0 %vm230_vm0, %v210_v31 }
  0x19   : > { %761 = vmatpush3.bf16.msra.mxu0 %v758_v28  ;;  %723 = vmatprep.mubr.msk.f32.mxu0 %vm230_vm0, %v393_v33 }
  0x1a   : > { %763 = vmatprep.subr.bf16.mxu0 %v762_v32  ;;  %686 = vmatmul.mubr.msk.f32.vlgmr.msra.gmra.mrb[0].mxu1 %vm230_vm0, %v220_v36 }
  0x1d   : > { %765 = vmatpush3.bf16.msra.mxu0 %v762_v32 }
  0x1e   : > { %767 = vmatprep.subr.bf16.mxu0 %v766_v37 }
  0x21   : > { %769 = vmatpush3.bf16.msra.mxu0 %v766_v37 }
  0x22   : > { %771 = vmatprep.subr.bf16.mxu0 %v770_v40 }
  0x25   : > { %773 = vmatpush3.bf16.msra.mxu0 %v770_v40 }
  0x28   : > { %724 = vmatmul.mubr.msk.f32.vlgmr.msra.gmra.mrb[0].mxu0 %vm230_vm0, %v394_v41 }
  0xed   : > { %v687_v43 = vpop.f32.mrb[0].mxu1 }
  0xee   : > { %v303_v44 = vpop.f32.mrb[1].mxu1 }
  0xfb   : > { %v725_v45 = vpop.f32.mrb[0].mxu0 }
  0xfc   : > { %v774_v47 = vadd.f32 %v725_v45, %v687_v43  ;;  %v476_v48 = vpop.f32.mrb[1].mxu0 }
  0xfd   : > { %v775_v49 = vadd.f32 %v476_v48, %v303_v44 }
  0xfe   : > { %v495_v50 = vadd.f32 %v774_v47, %v636_v46 }
  0xff   : > { %v494_v51 = vadd.f32 %v775_v49, %v636_v46 }
 0x100   : > { %v497_v52 = vmax.f32 %v495_v50, 0.0 }
 0x101   : > { %v496_v53 = vmax.f32 %v494_v51, 0.0 }
 0x102   : > { %500 = vst [vmem:[%s204_s25 + $0x9] sm:$0xff] %v497_v52  ;;  %v511_v54 = vmul.f32 %v497_v52, %v497_v52 }
 0x103   : > { %499 = vst [vmem:[%s204_s25 + $0x1] sm:$0xff] %v496_v53  ;;  %v502_v55 = vadd.f32 %v497_v52, %v496_v53  ;;  %v510_v56 = vmul.f32 %v496_v53, %v496_v53 }
 0x105   : > { %v503_v57 = vrot.slane %v502_v55, 4  ;;  %v512_v58 = vadd.f32 %v511_v54, %v510_v56 }
 0x107   : > { %v504_v59 = vadd.f32 %v503_v57, %v502_v55  ;;  %v513_v60 = vrot.slane %v512_v58, 4 }
 0x109   : > { %v505_v61 = vrot.slane %v504_v59, 2  ;;  %v514_v62 = vadd.f32 %v513_v60, %v512_v58 }
 0x10b   : > { %v506_v63 = vadd.f32 %v505_v61, %v504_v59  ;;  %v515_v0 = vrot.slane %v514_v62, 2 }
 0x10d   : > { %v507_v1 = vrot.slane %v506_v63, 1  ;;  %v516_v2 = vadd.f32 %v515_v0, %v514_v62 }
 0x10f   : > { %v508_v3 = vadd.f32 %v507_v1, %v506_v63  ;;  %v517_v4 = vrot.slane %v516_v2, 1 }
 0x111   : > { %509 = vst [vmem:[%s208_s29] sm:$0x1] %v508_v3  ;;  %v518_v5 = vadd.f32 %v517_v4, %v516_v2 }
 0x113   : > { %519 = vst [vmem:[%s208_s29 + $0x1] sm:$0x1] %v518_v5 }
 0x114 PF: > { %s15_s15 = sadd.s32 1, %s794_s15  }
 0x115   : > { %p12_p4 = scmp.ge.s32.totalorder %s15_s15, 4  }
 0x117   :  { %14 = sbr.rel (!%p12_p4) target bundleno = 1 (0x1), region = 76 }

// kernel: unet_conv_block.3
= control target key start
LH: loop header
LB: loop body
LE: loop exit
PB: predicated region body
PF: predicated region fallthrough
CT: control target
= control target key end

     0   :  { %s949_s15 = smov 0   ;;  %s1132_s0 = inlined_call_operand.vmem [shape: f32[2,18,128], index: 0, kind: input, shape index: {}]   ;;  %s1133_s1 = inlined_call_operand.vmem [shape: f32[3,128,128], index: 1, kind: input, shape index: {}]   ;;  %s1134_s2 = inlined_call_operand.vmem [shape: f32[16,128], index: 2, kind: input, shape index: {}]   ;;  %s1135_s3 = inlined_call_operand.vmem [shape: f32[2,16,128], index: 3, kind: output, shape index: {0}]   ;;  %s1136_s4 = inlined_call_operand.vmem [shape: f32[2,2,128], index: 4, kind: output, shape index: {1}]  }
   0x1 LB: > { %s604_s16 = sadd.s32 4294967295, %s922_s15   ;;  %p608_p0 = scmp.ge.s32.totalorder %s922_s15, 1  ;;  %s922_s15 = sphi %s949_s15, %s15_s15  }
   0x2   : > { %p165_p1 = scmp.lt.s32.totalorder %s922_s15, 3 }
   0x4   : > { %p166_p2 = pnand %p608_p0, %p165_p1 }
   0x5   : > { %v211_v0 = vld [vmem:[%s1133_s1] sm:$0xff] (!%p166_p2)  ;;  %v212_v1 = vld [vmem:[%s1133_s1 + $0x8] sm:$0xff] (!%p166_p2)  ;;  %v213_v2 = vld [vmem:[%s1133_s1 + $0x10] sm:$0xff] (!%p166_p2)  ;;  %p195_p3 = scmp.lt.s32.totalorder (!%p166_p2), %s604_s16, 1 }
   0x6   : > { %169 = sbr.rel (%p166_p2) target bundleno = 308 (0x134), region = 32  ;;  %v839_v3 = vpack.c.bf16 (!%p166_p2), %v212_v1, %v211_v0  ;;  %v214_v4 = vld [vmem:[%s1133_s1 + $0x18] sm:$0xff] (!%p166_p2)  ;;  %v215_v6 = vld [vmem:[%s1133_s1 + $0x20] sm:$0xff] (!%p166_p2)  ;;  %v216_v7 = vld [vmem:[%s1133_s1 + $0x28] sm:$0xff] (!%p166_p2) }
   0x7   : > { %v843_v5 = vpack.c.bf16 (!%p166_p2), %v214_v4, %v213_v2  ;;  %v847_v8 = vpack.c.bf16 (!%p166_p2), %v216_v7, %v215_v6  ;;  %v613_v9 = vld [vmem:[%s1133_s1 + $0x80] sm:$0xff] (!%p166_p2)  ;;  %v614_v10 = vld [vmem:[%s1133_s1 + $0x88] sm:$0xff] (!%p166_p2)  ;;  %v217_v11 = vld [vmem:[%s1133_s1 + $0x30] sm:$0xff] (!%p166_p2) }
   0x8   : > { %840 = vmatprep.subr.bf16.mxu0 (!%p166_p2), %v839_v3  ;;  %v218_v12 = vld [vmem:[%s1133_s1 + $0x38] sm:$0xff] (!%p166_p2)  ;;  %v807_v13 = vpack.c.bf16 (!%p166_p2), %v614_v10, %v613_v9  ;;  %v615_v14 = vld [vmem:[%s1133_s1 + $0x90] sm:$0xff] (!%p166_p2)  ;;  %v617_v18 = vld [vmem:[%s1133_s1 + $0xa0] sm:$0xff] (!%p166_p2) }
   0x9   : > { %842 = vmatpush3.bf16.msra.mxu0 (!%p166_p2), %v839_v3  ;;  %v616_v16 = vld [vmem:[%s1133_s1 + $0x98] sm:$0xff] (!%p166_p2)  ;;  %v851_v19 = vpack.c.bf16 (!%p166_p2), %v218_v12, %v217_v11  ;;  %v618_v20 = vld [vmem:[%s1133_s1 + $0xa8] sm:$0xff] (!%p166_p2)  ;;  %v219_v21 = vld [vmem:[%s1133_s1 + $0x40] sm:$0xff] (!%p166_p2) }
   0xa   : > { %844 = vmatprep.subr.bf16.mxu0 (!%p166_p2), %v843_v5  ;;  %808 = vmatprep.subr.bf16.mxu1 (!%p166_p2), %v807_v13  ;;  %v811_v17 = vpack.c.bf16 (!%p166_p2), %v616_v16, %v615_v14  ;;  %v220_v22 = vld [vmem:[%s1133_s1 + $0x48] sm:$0xff] (!%p166_p2)  ;;  %v815_v23 = vpack.c.bf16 (!%p166_p2), %v618_v20, %v617_v18  ;;  %v619_v24 = vld [vmem:[%s1133_s1 + $0xb0] sm:$0xff] (!%p166_p2)  ;;  %v620_v25 = vld [vmem:[%s1133_s1 + $0xb8] sm:$0xff] (!%p166_p2) }
   0xb   : > { %810 = vmatpush3.bf16.msra.mxu1 (!%p166_p2), %v807_v13  ;;  %v855_v26 = vpack.c.bf16 (!%p166_p2), %v220_v22, %v219_v21  ;;  %v221_v27 = vld [vmem:[%s1133_s1 + $0x50] sm:$0xff] (!%p166_p2)  ;;  %v222_v28 = vld [vmem:[%s1133_s1 + $0x58] sm:$0xff] (!%p166_p2)  ;;  %v819_v29 = vpack.c.bf16 (!%p166_p2), %v620_v25, %v619_v24  ;;  %v621_v30 = vld [vmem:[%s1133_s1 + $0xc0] sm:$0xff] (!%p166_p2) }
   0xc   : > { %812 = vmatprep.subr.bf16.mxu1 (!%p166_p2), %v811_v17  ;;  %v622_v31 = vld [vmem:[%s1133_s1 + $0xc8] sm:$0xff] (!%p166_p2)  ;;  %v859_v33 = vpack.c.bf16 (!%p166_p2), %v222_v28, %v221_v27  ;;  %v223_v34 = vld [vmem:[%s1133_s1 + $0x60] sm:$0xff] (!%p166_p2)  ;;  %v623_v37 = vld [vmem:[%s1133_s1 + $0xd0] sm:$0xff] (!%p166_p2) }
   0xd   : > { %s1138_s16 = smov (!%p195_p3, %s604_s16), 1  ;;  %846 = vmatpush3.bf16.msra.mxu0 %v843_v5  ;;  %v224_v35 = vld [vmem:[%s1133_s1 + $0x68] sm:$0xff]  ;;  %v823_v36 = vpack.c.bf16 %v622_v31, %v621_v30  ;;  %v624_v38 = vld [vmem:[%s1133_s1 + $0xd8] sm:$0xff]  ;;  %v225_v40 = vld [vmem:[%s1133_s1 + $0x70] sm:$0xff] }
   0xe   : > { %s907_s29 = smul.u32 24, %s1138_s16  ;;  %848 = vmatprep.subr.bf16.mxu0 %v847_v8  ;;  %v863_v39 = vpack.c.bf16 %v224_v35, %v223_v34  ;;  %v226_v41 = vld [vmem:[%s1133_s1 + $0x78] sm:$0xff]  ;;  %v827_v42 = vpack.c.bf16 %v624_v38, %v623_v37  ;;  %v625_v43 = vld [vmem:[%s1133_s1 + $0xe0] sm:$0xff]  ;;  %v626_v44 = vld [vmem:[%s1133_s1 + $0xe8] sm:$0xff]  ;;  %s647_s26 = sshll.u32 %s1138_s16, 4 }
   0xf   : > { %814 = vmatpush3.bf16.msra.mxu1 %v811_v17  ;;  %v867_v45 = vpack.c.bf16 %v226_v41, %v225_v40  ;;  %v629_v46 = vld [vmem:[%s1133_s1 + $0x100] sm:$0xff]  ;;  %v630_v47 = vld [vmem:[%s1133_s1 + $0x108] sm:$0xff]  ;;  %v831_v48 = vpack.c.bf16 %v626_v44, %v625_v43  ;;  %v627_v49 = vld [vmem:[%s1133_s1 + $0xf0] sm:$0xff]  ;;  %s612_s5 = sshll.u32 %s1138_s16, 1 }
  0x10   : > { %s993_s14 = scalar_lea.vmem %s1132_s0, %s907_s29  ;;  %816 = vmatprep.subr.bf16.mxu1 %v815_v23  ;;  %v628_v50 = vld [vmem:[%s1133_s1 + $0xf8] sm:$0xff]  ;;  %v871_v51 = vpack.c.bf16 %v630_v47, %v629_v46  ;;  %v631_v52 = vld [vmem:[%s1133_s1 + $0x110] sm:$0xff]  ;;  %v633_v58 = vld [vmem:[%s1133_s1 + $0x120] sm:$0xff]  ;;  %s208_s8 = scalar_lea.vmem %s1136_s4, %s612_s5 }
  0x11   : > { %v209_v15 = vld [vmem:[%s993_s14] sm:$0xff]  ;;  %850 = vmatpush3.bf16.msra.mxu0 %v847_v8  ;;  %v632_v53 = vld [vmem:[%s1133_s1 + $0x118] sm:$0xff]  ;;  %v835_v54 = vpack.c.bf16 %v628_v50, %v627_v49  ;;  %v210_v55 = vld [vmem:[%s993_s14 + $0x8] sm:$0xff] }
  0x12   : > { %769 = vmatprep.mubr.f32.mxu0 %v209_v15  ;;  %852 = vmatprep.subr.bf16.mxu0 %v851_v19  ;;  %v227_v32 = vld [vmem:[%s993_s14 + $0x1] sm:$0xff]  ;;  %v875_v56 = vpack.c.bf16 %v632_v53, %v631_v52  ;;  %v228_v61 = vld [vmem:[%s993_s14 + $0x9] sm:$0xff]  ;;  %v636_v63 = vld [vmem:[%s1133_s1 + $0x138] sm:$0xff] }
  0x13   : > { %818 = vmatpush3.bf16.msra.mxu1 %v815_v23  ;;  %734 = vmatprep.mubr.f32.mxu1 %v227_v32  ;;  %v396_v57 = vld [vmem:[%s993_s14 + $0x2] sm:$0xff]  ;;  %v635_v62 = vld [vmem:[%s1133_s1 + $0x130] sm:$0xff]  ;;  %v640_v5 = vld [vmem:[%s1133_s1 + $0x158] sm:$0xff] }
  0x14   : > { %820 = vmatprep.subr.bf16.mxu1 %v819_v29  ;;  %v634_v59 = vld [vmem:[%s1133_s1 + $0x128] sm:$0xff]  ;;  %v883_v0 = vpack.c.bf16 %v636_v63, %v635_v62  ;;  %v637_v1 = vld [vmem:[%s1133_s1 + $0x140] sm:$0xff]  ;;  %v639_v4 = vld [vmem:[%s1133_s1 + $0x150] sm:$0xff] }
  0x15   : > { %854 = vmatpush3.bf16.msra.mxu0 %v851_v19  ;;  %v879_v60 = vpack.c.bf16 %v634_v59, %v633_v58  ;;  %v638_v2 = vld [vmem:[%s1133_s1 + $0x148] sm:$0xff]  ;;  %v891_v6 = vpack.c.bf16 %v640_v5, %v639_v4  ;;  %v641_v7 = vld [vmem:[%s1133_s1 + $0x160] sm:$0xff]  ;;  %v643_v10 = vld [vmem:[%s1133_s1 + $0x170] sm:$0xff] }
  0x16   : > { %856 = vmatprep.subr.bf16.mxu0 %v855_v26  ;;  %v887_v3 = vpack.c.bf16 %v638_v2, %v637_v1  ;;  %v642_v8 = vld [vmem:[%s1133_s1 + $0x168] sm:$0xff]  ;;  %v644_v11 = vld [vmem:[%s1133_s1 + $0x178] sm:$0xff]  ;;  %v492_v20 = vld [vmem:[%s1134_s2] sm:$0xff] }
  0x17   : > { %822 = vmatpush3.bf16.msra.mxu1 %v819_v29  ;;  %v895_v9 = vpack.c.bf16 %v642_v8, %v641_v7  ;;  %v899_v12 = vpack.c.bf16 %v644_v11, %v643_v10  ;;  %v397_v13 = vld [vmem:[%s993_s14 + $0xa] sm:$0xff]  ;;  %s204_s14 = scalar_lea.vmem %s1135_s3, %s647_s26 }
  0x18   : > { %824 = vmatprep.subr.bf16.mxu1 %v823_v36  ;;  %v493_v17 = vld [vmem:[%s1134_s2 + $0x8] sm:$0xff] }
  0x19   : > { %858 = vmatpush3.bf16.msra.mxu0 %v855_v26 }
  0x1a   : > { %860 = vmatprep.subr.bf16.mxu0 %v859_v33 }
  0x1b   : > { %826 = vmatpush3.bf16.msra.mxu1 %v823_v36 }
  0x1c   : > { %828 = vmatprep.subr.bf16.mxu1 %v827_v42 }
  0x1d   : > { %862 = vmatpush3.bf16.msra.mxu0 %v859_v33 }
  0x1e   : > { %864 = vmatprep.subr.bf16.mxu0 %v863_v39 }
  0x1f   : > { %830 = vmatpush3.bf16.msra.mxu1 %v827_v42 }
  0x20   : > { %832 = vmatprep.subr.bf16.mxu1 %v831_v48 }
  0x21   : > { %866 = vmatpush3.bf16.msra.mxu0 %v863_v39 }
  0x22   : > { %868 = vmatprep.subr.bf16.mxu0 %v867_v45 }
  0x23   : > { %834 = vmatpush3.bf16.msra.mxu1 %v831_v48 }
  0x24   : > { %836 = vmatprep.subr.bf16.mxu1 %v835_v54 }
  0x25   : > { %870 = vmatpush3.bf16.msra.mxu0 %v867_v45 }
  0x26   : > { %872 = vmatprep.subr.bf16.mxu0 %v871_v51 }
  0x27   : > { %838 = vmatpush3.bf16.msra.mxu1 %v835_v54 }
  0x28   : > { %770 = vmatmul.mubr.f32.vlgmr.msra.gmra.mrb[0].mxu0 %v210_v55 }
  0x29   : > { %874 = vmatpush3.bf16.msra.mxu0 %v871_v51  ;;  %804 = vmatprep.mubr.f32.mxu0 %v396_v57 }
  0x2a   : > { %876 = vmatprep.subr.bf16.mxu0 %v875_v56  ;;  %735 = vmatmul.mubr.f32.vlgmr.msra.gmra.mrb[0].mxu1 %v228_v61 }
  0x2d   : > { %878 = vmatpush3.bf16.msra.mxu0 %v875_v56 }
  0x2e   : > { %880 = vmatprep.subr.bf16.mxu0 %v879_v60 }
  0x31   : > { %882 = vmatpush3.bf16.msra.mxu0 %v879_v60 }
  0x32   : > { %884 = vmatprep.subr.bf16.mxu0 %v883_v0 }
  0x35   : > { %886 = vmatpush3.bf16.msra.mxu0 %v883_v0 }
  0x36   : > { %888 = vmatprep.subr.bf16.mxu0 %v887_v3 }
  0x39   : > { %890 = vmatpush3.bf16.msra.mxu0 %v887_v3 }
  0x3a   : > { %892 = vmatprep.subr.bf16.mxu0 %v891_v6 }
  0x3d   : > { %894 = vmatpush3.bf16.msra.mxu0 %v891_v6 }
  0x3e   : > { %896 = vmatprep.subr.bf16.mxu0 %v895_v9 }
  0x41   : > { %898 = vmatpush3.bf16.msra.mxu0 %v895_v9 }
  0x42   : > { %900 = vmatprep.subr.bf16.mxu0 %v899_v12 }
  0x45   : > { %902 = vmatpush3.bf16.msra.mxu0 %v899_v12 }
  0x48   : > { %805 = vmatmul.mubr.f32.vlgmr.msra.gmra.mrb[0].mxu0 %v397_v13 }
  0xfd   : > { %v736_v14 = vpop.f32.mrb[0].mxu1 }
  0xfe   : > { %v312_v15 = vpop.f32.mrb[1].mxu1 }
 0x11b   : > { %v806_v16 = vpop.f32.mrb[0].mxu0 }
 0x11c   : > { %v903_v18 = vadd.f32 %v806_v16, %v736_v14  ;;  %v481_v19 = vpop.f32.mrb[1].mxu0 }
 0x11d   : > { %v904_v21 = vadd.f32 %v481_v19, %v312_v15 }
 0x11e   : > { %v495_v22 = vadd.f32 %v903_v18, %v493_v17 }
 0x11f   : > { %v494_v23 = vadd.f32 %v904_v21, %v492_v20 }
 0x120   : > { %v497_v24 = vmax.f32 %v495_v22, 0.0 }
 0x121   : > { %v496_v25 = vmax.f32 %v494_v23, 0.0 }
 0x122   : > { %499 = vst [vmem:[%s204_s14 + $0x8] sm:$0xff] %v497_v24  ;;  %v509_v26 = vmul.f32 %v497_v24, %v497_v24 }
 0x123   : > { %498 = vst [vmem:[%s204_s14] sm:$0xff] %v496_v25  ;;  %v500_v27 = vadd.f32 %v497_v24, %v496_v25  ;;  %v508_v28 = vmul.f32 %v496_v25, %v496_v25 }
 0x125   : > { %v501_v29 = vrot.slane %v500_v27, 4  ;;  %v510_v30 = vadd.f32 %v509_v26, %v508_v28 }
 0x127   : > { %v502_v31 = vadd.f32 %v501_v29, %v500_v27  ;;  %v511_v32 = vrot.slane %v510_v30, 4 }
 0x129   : > { %v503_v33 = vrot.slane %v502_v31, 2  ;;  %v512_v34 = vadd.f32 %v511_v32, %v510_v30 }
 0x12b   : > { %v504_v35 = vadd.f32 %v503_v33, %v502_v31  ;;  %v513_v36 = vrot.slane %v512_v34, 2 }
 0x12d   : > { %v505_v37 = vrot.slane %v504_v35, 1  ;;  %v514_v38 = vadd.f32 %v513_v36, %v512_v34 }
 0x12f   : > { %v506_v39 = vadd.f32 %v505_v37, %v504_v35  ;;  %v515_v40 = vrot.slane %v514_v38, 1 }
 0x131   : > { %507 = vst [vmem:[%s208_s8] sm:$0x1] %v506_v39  ;;  %v516_v41 = vadd.f32 %v515_v40, %v514_v38 }
 0x133   : > { %517 = vst [vmem:[%s208_s8 + $0x1] sm:$0x1] %v516_v41 }
 0x134 PF: > { %s15_s15 = sadd.s32 1, %s922_s15  }
 0x135   : > { %p12_p4 = scmp.ge.s32.totalorder %s15_s15, 4  }
 0x137   :  { %14 = sbr.rel (!%p12_p4) target bundleno = 1 (0x1), region = 76 }

</bundles_post_ra>
